<compile_context>
chip_gen: v7x
topology: tpu7x:2x2x1
jax: 0.10.0
libtpu: 0.0.40
codegen_flags: <defaults>
</compile_context>

<pallas_src>
import jax
import jax.numpy as jnp
import numpy as np
from jax import lax
from jax.experimental import pallas as pl
from jax.experimental.pallas import tpu as pltpu


def conv_encoder_kernel(x_ref, wconv_ref, bconv_ref, wd_ref, bd_ref,
                        out_ref, ctx_ref):
    """Whole-batch fused ConvEncoder forward (single invocation, no grid).

    x_ref:     (S*B, IC)   f32  time-major flat input, row s*B + b == token_embed[s, b, :]
    wconv_ref: (K, IC, OC) bf16 conv weight, wconv_ref[k, ic, oc] == wconv_pt[oc, ic, k]
    bconv_ref: (1, OC)     f32  conv bias
    wd_ref:    (T, OC, O)  bf16 dense weight, wd_ref[t, oc, o] == wd_pt[o, oc*T + t]
    bd_ref:    (1, O)      f32  dense bias
    out_ref:   (B, O)      f32  token_out
    ctx_ref:   (T*B, OC)   f32  token_context slab, row t*B + b == ctx[t, b, :]
    """
    B, O = out_ref.shape
    TB, OC = ctx_ref.shape
    T = TB // B
    K = wconv_ref.shape[0]

    x = x_ref[...].astype(jnp.bfloat16)               # (S*B, IC), one cast

    # --- Conv1d (valid padding, stride 1): K tap-wise matmuls, f32 accumulation ----
    # Tap k needs rows (t+k, b) == flat rows [k*B, k*B + T*B): a static sublane-offset
    # slice of x, so no cross-lane data movement (no im2col concat needed).
    acc = jnp.zeros((TB, OC), jnp.float32)
    for k in range(K):                                # K is small & static -> unrolled
        acc = acc + jnp.dot(x[k * B:k * B + TB, :], wconv_ref[k],
                            preferred_element_type=jnp.float32)
    ctx = jnp.maximum(acc + bconv_ref[...], 0.0)      # bias + ReLU in f32
    ctx_ref[...] = ctx.astype(ctx_ref.dtype)

    # --- Flatten (channel-major order baked into wd) + Linear + ReLU ---------------
    # out[b, o] = sum_t ctx[t*B + b, :] @ wd[t]: T group-wise matmuls, f32 accumulation;
    # again only static sublane slices, no lane-axis concat or transpose.
    ctx_b = ctx.astype(jnp.bfloat16)
    dacc = jnp.zeros((B, O), jnp.float32)
    for t in range(T):                                # T static -> unrolled
        dacc = dacc + jnp.dot(ctx_b[t * B:(t + 1) * B, :], wd_ref[t],
                              preferred_element_type=jnp.float32)
    # F.dropout with p=0.0 (applied twice in PyTorch) -> identity; final ReLU.
    out_ref[...] = jnp.maximum(dacc + bd_ref[...], 0.0).astype(out_ref.dtype)


def conv_encoder_forward(token_embed, wconv_pt, bconv, wd_pt, bd):
    """token_embed: (S, B, IC) float32. PyTorch parameter layouts:
       wconv_pt (OC, IC, K), bconv (OC,), wd_pt (O, OC*T), bd (O,)."""
    S, B, IC = token_embed.shape
    OC, _, K = wconv_pt.shape
    O = wd_pt.shape[0]
    T = S - K + 1                                     # get_conv_output_length(S, K)

    # Free (contiguous) reshape: row s*B + b == token_embed[s, b, :]. No transpose.
    x_flat = token_embed.reshape(S * B, IC)
    # Conv weight, tap-major: wconv3[k, ic, oc] = wconv_pt[oc, ic, k].
    wconv3 = jnp.transpose(wconv_pt, (2, 1, 0)).astype(jnp.bfloat16)        # (K, IC, OC)
    # Dense weight with PyTorch's channel-major .view(batch, -1) flatten order baked in:
    # wd3[t, oc, o] = wd_pt[o, oc*T + t].
    wd3 = jnp.transpose(wd_pt.reshape(O, OC, T), (2, 1, 0)).astype(jnp.bfloat16)  # (T, OC, O)

    vmem = lambda: pl.BlockSpec(memory_space=pltpu.MemorySpace.VMEM)
    out, ctx = pl.pallas_call(
        conv_encoder_kernel,
        out_shape=(jax.ShapeDtypeStruct((B, O), jnp.float32),
                   jax.ShapeDtypeStruct((T * B, OC), jnp.float32)),
        in_specs=[vmem() for _ in range(5)],          # whole arrays, VMEM-resident
        out_specs=(vmem(), vmem()),
    )(x_flat, wconv3, bconv.reshape(1, OC), wd3, bd.reshape(1, O))

    token_out = out                                   # (batch, output_size)
    token_context = ctx.reshape(T, B, OC)             # free reshape -> (conv_len, batch, OC)
    return token_out, token_context


def reference_forward(token_embed, wconv_pt, bconv, wd_pt, bd):
    """Pure-JAX f32 reference mirroring PyTorch NCW conv + channel-major flatten."""
    S, B, IC = token_embed.shape
    OC, _, K = wconv_pt.shape
    T = S - K + 1
    x_ncw = jnp.transpose(token_embed, (1, 2, 0))             # (B, IC, S)
    ctx_ncw = lax.conv_general_dilated(
        x_ncw, wconv_pt, window_strides=(1,), padding='VALID',
        dimension_numbers=('NCH', 'OIH', 'NCH')) + bconv[None, :, None]
    ctx_ncw = jnp.maximum(ctx_ncw, 0.0)                       # (B, OC, T)
    flat = ctx_ncw.reshape(B, OC * T)                         # PyTorch .view(batch, -1)
    out = jnp.maximum(flat @ wd_pt.T + bd, 0.0)
    return out, jnp.transpose(ctx_ncw, (2, 0, 1))


# TODO(synk): only the pooling='flatten', dropout=0.0 configuration of ConvEncoder is
# implemented; the unused 'rnn'/'max' BottleEncoder branches are not translated.

if __name__ == "__main__":
    key = jax.random.PRNGKey(0)
    k1, k2, k3, k4, k5 = jax.random.split(key, 5)

    # Small shapes consistent with the module.
    seq_len, batch, emb_dim = 12, 4, 8     # token_len=12, in_channels=emb_dim=8
    out_channels, kernel_size = 16, 3
    output_size = 32
    conv_len = seq_len - kernel_size + 1   # 10

    token_embed = jax.random.normal(k1, (seq_len, batch, emb_dim), jnp.float32)
    # Deterministic synthetic parameters (PyTorch layouts).
    wconv_pt = 0.1 * jax.random.normal(k2, (out_channels, emb_dim, kernel_size), jnp.float32)
    bconv = 0.1 * jax.random.normal(k3, (out_channels,), jnp.float32)
    wd_pt = 0.1 * jax.random.normal(k4, (output_size, out_channels * conv_len), jnp.float32)
    bd = 0.1 * jax.random.normal(k5, (output_size,), jnp.float32)

    token_out, token_context = conv_encoder_forward(token_embed, wconv_pt, bconv, wd_pt, bd)
    jax.block_until_ready((token_out, token_context))

    ref_out, ref_ctx = reference_forward(token_embed, wconv_pt, bconv, wd_pt, bd)
    assert token_out.shape == (batch, output_size)
    assert token_context.shape == (conv_len, batch, out_channels)
    # bf16 MXU operands (f32 accumulation) vs the f32 reference -> loosened tolerances.
    np.testing.assert_allclose(np.asarray(token_out), np.asarray(ref_out), rtol=3e-2, atol=3e-2)
    np.testing.assert_allclose(np.asarray(token_context), np.asarray(ref_ctx), rtol=3e-2, atol=3e-2)

    print("KERNEL_OK")
</pallas_src>

<mosaic_0001>
module attributes {stable_mosaic.version = 11 : i64} {
  func.func @conv_encoder_kernel(%arg0: memref<48x8xf32, #tpu.memory_space<vmem>>, %arg1: memref<3x8x16xbf16, #tpu.memory_space<vmem>>, %arg2: memref<1x16xf32, #tpu.memory_space<vmem>>, %arg3: memref<10x16x32xbf16, #tpu.memory_space<vmem>>, %arg4: memref<1x32xf32, #tpu.memory_space<vmem>>, %arg5: memref<4x32xf32, #tpu.memory_space<vmem>>, %arg6: memref<40x16xf32, #tpu.memory_space<vmem>>) attributes {dimension_semantics = [], scalar_prefetch = 0 : i64, scratch_operands = 0 : i64, tpu.core_type = #tpu.core_type<tc>} {
    %c0 = arith.constant 0 : index
    %c0_0 = arith.constant 0 : index
    %0 = vector.load %arg0[%c0, %c0_0] : memref<48x8xf32, #tpu.memory_space<vmem>>, vector<48x8xf32>
    %1 = arith.truncf %0 : vector<48x8xf32> to vector<48x8xbf16>
    %cst = arith.constant 0.000000e+00 : f32
    %2 = vector.broadcast %cst : f32 to vector<40x16xf32>
    %3 = vector.extract_strided_slice %1 {offsets = [0, 0], sizes = [40, 8], strides = [1, 1]} : vector<48x8xbf16> to vector<40x8xbf16>
    %c0_1 = arith.constant 0 : index
    %c0_2 = arith.constant 0 : index
    %c0_3 = arith.constant 0 : index
    %4 = vector.load %arg1[%c0_1, %c0_2, %c0_3] : memref<3x8x16xbf16, #tpu.memory_space<vmem>>, vector<1x8x16xbf16>
    %5 = vector.shape_cast %4 : vector<1x8x16xbf16> to vector<8x16xbf16>
    %cst_4 = arith.constant dense<0.000000e+00> : vector<40x16xf32>
    %6 = tpu.matmul %3, %5, %cst_4 {dimension_numbers = #tpu.dot_dimension_numbers<[1], [0], [0], [1], [0, 0, 1, 1], [], []>} : vector<40x8xbf16>, vector<8x16xbf16>, vector<40x16xf32> -> vector<40x16xf32>
    %7 = arith.addf %2, %6 : vector<40x16xf32>
    %8 = vector.extract_strided_slice %1 {offsets = [4, 0], sizes = [40, 8], strides = [1, 1]} : vector<48x8xbf16> to vector<40x8xbf16>
    %c1 = arith.constant 1 : index
    %c0_5 = arith.constant 0 : index
    %c0_6 = arith.constant 0 : index
    %9 = vector.load %arg1[%c1, %c0_5, %c0_6] : memref<3x8x16xbf16, #tpu.memory_space<vmem>>, vector<1x8x16xbf16>
    %10 = vector.shape_cast %9 : vector<1x8x16xbf16> to vector<8x16xbf16>
    %cst_7 = arith.constant dense<0.000000e+00> : vector<40x16xf32>
    %11 = tpu.matmul %8, %10, %cst_7 {dimension_numbers = #tpu.dot_dimension_numbers<[1], [0], [0], [1], [0, 0, 1, 1], [], []>} : vector<40x8xbf16>, vector<8x16xbf16>, vector<40x16xf32> -> vector<40x16xf32>
    %12 = arith.addf %7, %11 : vector<40x16xf32>
    %13 = vector.extract_strided_slice %1 {offsets = [8, 0], sizes = [40, 8], strides = [1, 1]} : vector<48x8xbf16> to vector<40x8xbf16>
    %c2 = arith.constant 2 : index
    %c0_8 = arith.constant 0 : index
    %c0_9 = arith.constant 0 : index
    %14 = vector.load %arg1[%c2, %c0_8, %c0_9] : memref<3x8x16xbf16, #tpu.memory_space<vmem>>, vector<1x8x16xbf16>
    %15 = vector.shape_cast %14 : vector<1x8x16xbf16> to vector<8x16xbf16>
    %cst_10 = arith.constant dense<0.000000e+00> : vector<40x16xf32>
    %16 = tpu.matmul %13, %15, %cst_10 {dimension_numbers = #tpu.dot_dimension_numbers<[1], [0], [0], [1], [0, 0, 1, 1], [], []>} : vector<40x8xbf16>, vector<8x16xbf16>, vector<40x16xf32> -> vector<40x16xf32>
    %17 = arith.addf %12, %16 : vector<40x16xf32>
    %c0_11 = arith.constant 0 : index
    %c0_12 = arith.constant 0 : index
    %18 = vector.load %arg2[%c0_11, %c0_12] : memref<1x16xf32, #tpu.memory_space<vmem>>, vector<1x16xf32>
    %19 = vector.broadcast %18 : vector<1x16xf32> to vector<40x16xf32>
    %20 = arith.addf %17, %19 : vector<40x16xf32>
    %cst_13 = arith.constant 0.000000e+00 : f32
    %21 = vector.broadcast %cst_13 : f32 to vector<40x16xf32>
    %22 = arith.maximumf %20, %21 : vector<40x16xf32>
    %c0_14 = arith.constant 0 : index
    %c0_15 = arith.constant 0 : index
    %23 = vector.load %arg6[%c0_14, %c0_15] : memref<40x16xf32, #tpu.memory_space<vmem>>, vector<40x16xf32>
    tpu.vector_store %arg6[%c0_14, %c0_15], %22 {strides = array<i32>} : memref<40x16xf32, #tpu.memory_space<vmem>>, vector<40x16xf32>,
    %24 = arith.truncf %22 : vector<40x16xf32> to vector<40x16xbf16>
    %cst_16 = arith.constant 0.000000e+00 : f32
    %25 = vector.broadcast %cst_16 : f32 to vector<4x32xf32>
    %26 = vector.extract_strided_slice %24 {offsets = [0, 0], sizes = [4, 16], strides = [1, 1]} : vector<40x16xbf16> to vector<4x16xbf16>
    %c0_17 = arith.constant 0 : index
    %c0_18 = arith.constant 0 : index
    %c0_19 = arith.constant 0 : index
    %27 = vector.load %arg3[%c0_17, %c0_18, %c0_19] : memref<10x16x32xbf16, #tpu.memory_space<vmem>>, vector<1x16x32xbf16>
    %28 = vector.shape_cast %27 : vector<1x16x32xbf16> to vector<16x32xbf16>
    %cst_20 = arith.constant dense<0.000000e+00> : vector<4x32xf32>
    %29 = tpu.matmul %26, %28, %cst_20 {dimension_numbers = #tpu.dot_dimension_numbers<[1], [0], [0], [1], [0, 0, 1, 1], [], []>} : vector<4x16xbf16>, vector<16x32xbf16>, vector<4x32xf32> -> vector<4x32xf32>
    %30 = arith.addf %25, %29 : vector<4x32xf32>
    %31 = vector.extract_strided_slice %24 {offsets = [4, 0], sizes = [4, 16], strides = [1, 1]} : vector<40x16xbf16> to vector<4x16xbf16>
    %c1_21 = arith.constant 1 : index
    %c0_22 = arith.constant 0 : index
    %c0_23 = arith.constant 0 : index
    %32 = vector.load %arg3[%c1_21, %c0_22, %c0_23] : memref<10x16x32xbf16, #tpu.memory_space<vmem>>, vector<1x16x32xbf16>
    %33 = vector.shape_cast %32 : vector<1x16x32xbf16> to vector<16x32xbf16>
    %cst_24 = arith.constant dense<0.000000e+00> : vector<4x32xf32>
    %34 = tpu.matmul %31, %33, %cst_24 {dimension_numbers = #tpu.dot_dimension_numbers<[1], [0], [0], [1], [0, 0, 1, 1], [], []>} : vector<4x16xbf16>, vector<16x32xbf16>, vector<4x32xf32> -> vector<4x32xf32>
    %35 = arith.addf %30, %34 : vector<4x32xf32>
    %36 = vector.extract_strided_slice %24 {offsets = [8, 0], sizes = [4, 16], strides = [1, 1]} : vector<40x16xbf16> to vector<4x16xbf16>
    %c2_25 = arith.constant 2 : index
    %c0_26 = arith.constant 0 : index
    %c0_27 = arith.constant 0 : index
    %37 = vector.load %arg3[%c2_25, %c0_26, %c0_27] : memref<10x16x32xbf16, #tpu.memory_space<vmem>>, vector<1x16x32xbf16>
    %38 = vector.shape_cast %37 : vector<1x16x32xbf16> to vector<16x32xbf16>
    %cst_28 = arith.constant dense<0.000000e+00> : vector<4x32xf32>
    %39 = tpu.matmul %36, %38, %cst_28 {dimension_numbers = #tpu.dot_dimension_numbers<[1], [0], [0], [1], [0, 0, 1, 1], [], []>} : vector<4x16xbf16>, vector<16x32xbf16>, vector<4x32xf32> -> vector<4x32xf32>
    %40 = arith.addf %35, %39 : vector<4x32xf32>
    %41 = vector.extract_strided_slice %24 {offsets = [12, 0], sizes = [4, 16], strides = [1, 1]} : vector<40x16xbf16> to vector<4x16xbf16>
    %c3 = arith.constant 3 : index
    %c0_29 = arith.constant 0 : index
    %c0_30 = arith.constant 0 : index
    %42 = vector.load %arg3[%c3, %c0_29, %c0_30] : memref<10x16x32xbf16, #tpu.memory_space<vmem>>, vector<1x16x32xbf16>
    %43 = vector.shape_cast %42 : vector<1x16x32xbf16> to vector<16x32xbf16>
    %cst_31 = arith.constant dense<0.000000e+00> : vector<4x32xf32>
    %44 = tpu.matmul %41, %43, %cst_31 {dimension_numbers = #tpu.dot_dimension_numbers<[1], [0], [0], [1], [0, 0, 1, 1], [], []>} : vector<4x16xbf16>, vector<16x32xbf16>, vector<4x32xf32> -> vector<4x32xf32>
    %45 = arith.addf %40, %44 : vector<4x32xf32>
    %46 = vector.extract_strided_slice %24 {offsets = [16, 0], sizes = [4, 16], strides = [1, 1]} : vector<40x16xbf16> to vector<4x16xbf16>
    %c4 = arith.constant 4 : index
    %c0_32 = arith.constant 0 : index
    %c0_33 = arith.constant 0 : index
    %47 = vector.load %arg3[%c4, %c0_32, %c0_33] : memref<10x16x32xbf16, #tpu.memory_space<vmem>>, vector<1x16x32xbf16>
    %48 = vector.shape_cast %47 : vector<1x16x32xbf16> to vector<16x32xbf16>
    %cst_34 = arith.constant dense<0.000000e+00> : vector<4x32xf32>
    %49 = tpu.matmul %46, %48, %cst_34 {dimension_numbers = #tpu.dot_dimension_numbers<[1], [0], [0], [1], [0, 0, 1, 1], [], []>} : vector<4x16xbf16>, vector<16x32xbf16>, vector<4x32xf32> -> vector<4x32xf32>
    %50 = arith.addf %45, %49 : vector<4x32xf32>
    %51 = vector.extract_strided_slice %24 {offsets = [20, 0], sizes = [4, 16], strides = [1, 1]} : vector<40x16xbf16> to vector<4x16xbf16>
    %c5 = arith.constant 5 : index
    %c0_35 = arith.constant 0 : index
    %c0_36 = arith.constant 0 : index
    %52 = vector.load %arg3[%c5, %c0_35, %c0_36] : memref<10x16x32xbf16, #tpu.memory_space<vmem>>, vector<1x16x32xbf16>
    %53 = vector.shape_cast %52 : vector<1x16x32xbf16> to vector<16x32xbf16>
    %cst_37 = arith.constant dense<0.000000e+00> : vector<4x32xf32>
    %54 = tpu.matmul %51, %53, %cst_37 {dimension_numbers = #tpu.dot_dimension_numbers<[1], [0], [0], [1], [0, 0, 1, 1], [], []>} : vector<4x16xbf16>, vector<16x32xbf16>, vector<4x32xf32> -> vector<4x32xf32>
    %55 = arith.addf %50, %54 : vector<4x32xf32>
    %56 = vector.extract_strided_slice %24 {offsets = [24, 0], sizes = [4, 16], strides = [1, 1]} : vector<40x16xbf16> to vector<4x16xbf16>
    %c6 = arith.constant 6 : index
    %c0_38 = arith.constant 0 : index
    %c0_39 = arith.constant 0 : index
    %57 = vector.load %arg3[%c6, %c0_38, %c0_39] : memref<10x16x32xbf16, #tpu.memory_space<vmem>>, vector<1x16x32xbf16>
    %58 = vector.shape_cast %57 : vector<1x16x32xbf16> to vector<16x32xbf16>
    %cst_40 = arith.constant dense<0.000000e+00> : vector<4x32xf32>
    %59 = tpu.matmul %56, %58, %cst_40 {dimension_numbers = #tpu.dot_dimension_numbers<[1], [0], [0], [1], [0, 0, 1, 1], [], []>} : vector<4x16xbf16>, vector<16x32xbf16>, vector<4x32xf32> -> vector<4x32xf32>
    %60 = arith.addf %55, %59 : vector<4x32xf32>
    %61 = vector.extract_strided_slice %24 {offsets = [28, 0], sizes = [4, 16], strides = [1, 1]} : vector<40x16xbf16> to vector<4x16xbf16>
    %c7 = arith.constant 7 : index
    %c0_41 = arith.constant 0 : index
    %c0_42 = arith.constant 0 : index
    %62 = vector.load %arg3[%c7, %c0_41, %c0_42] : memref<10x16x32xbf16, #tpu.memory_space<vmem>>, vector<1x16x32xbf16>
    %63 = vector.shape_cast %62 : vector<1x16x32xbf16> to vector<16x32xbf16>
    %cst_43 = arith.constant dense<0.000000e+00> : vector<4x32xf32>
    %64 = tpu.matmul %61, %63, %cst_43 {dimension_numbers = #tpu.dot_dimension_numbers<[1], [0], [0], [1], [0, 0, 1, 1], [], []>} : vector<4x16xbf16>, vector<16x32xbf16>, vector<4x32xf32> -> vector<4x32xf32>
    %65 = arith.addf %60, %64 : vector<4x32xf32>
    %66 = vector.extract_strided_slice %24 {offsets = [32, 0], sizes = [4, 16], strides = [1, 1]} : vector<40x16xbf16> to vector<4x16xbf16>
    %c8 = arith.constant 8 : index
    %c0_44 = arith.constant 0 : index
    %c0_45 = arith.constant 0 : index
    %67 = vector.load %arg3[%c8, %c0_44, %c0_45] : memref<10x16x32xbf16, #tpu.memory_space<vmem>>, vector<1x16x32xbf16>
    %68 = vector.shape_cast %67 : vector<1x16x32xbf16> to vector<16x32xbf16>
    %cst_46 = arith.constant dense<0.000000e+00> : vector<4x32xf32>
    %69 = tpu.matmul %66, %68, %cst_46 {dimension_numbers = #tpu.dot_dimension_numbers<[1], [0], [0], [1], [0, 0, 1, 1], [], []>} : vector<4x16xbf16>, vector<16x32xbf16>, vector<4x32xf32> -> vector<4x32xf32>
    %70 = arith.addf %65, %69 : vector<4x32xf32>
    %71 = vector.extract_strided_slice %24 {offsets = [36, 0], sizes = [4, 16], strides = [1, 1]} : vector<40x16xbf16> to vector<4x16xbf16>
    %c9 = arith.constant 9 : index
    %c0_47 = arith.constant 0 : index
    %c0_48 = arith.constant 0 : index
    %72 = vector.load %arg3[%c9, %c0_47, %c0_48] : memref<10x16x32xbf16, #tpu.memory_space<vmem>>, vector<1x16x32xbf16>
    %73 = vector.shape_cast %72 : vector<1x16x32xbf16> to vector<16x32xbf16>
    %cst_49 = arith.constant dense<0.000000e+00> : vector<4x32xf32>
    %74 = tpu.matmul %71, %73, %cst_49 {dimension_numbers = #tpu.dot_dimension_numbers<[1], [0], [0], [1], [0, 0, 1, 1], [], []>} : vector<4x16xbf16>, vector<16x32xbf16>, vector<4x32xf32> -> vector<4x32xf32>
    %75 = arith.addf %70, %74 : vector<4x32xf32>
    %c0_50 = arith.constant 0 : index
    %c0_51 = arith.constant 0 : index
    %76 = vector.load %arg4[%c0_50, %c0_51] : memref<1x32xf32, #tpu.memory_space<vmem>>, vector<1x32xf32>
    %77 = vector.broadcast %76 : vector<1x32xf32> to vector<4x32xf32>
    %78 = arith.addf %75, %77 : vector<4x32xf32>
    %cst_52 = arith.constant 0.000000e+00 : f32
    %79 = vector.broadcast %cst_52 : f32 to vector<4x32xf32>
    %80 = arith.maximumf %78, %79 : vector<4x32xf32>
    %c0_53 = arith.constant 0 : index
    %c0_54 = arith.constant 0 : index
    %81 = vector.load %arg5[%c0_53, %c0_54] : memref<4x32xf32, #tpu.memory_space<vmem>>, vector<4x32xf32>
    tpu.vector_store %arg5[%c0_53, %c0_54], %80 {strides = array<i32>} : memref<4x32xf32, #tpu.memory_space<vmem>>, vector<4x32xf32>,
    return
  }
}

</mosaic_0001>

<bundles_post_ra>
// kernel: tpu_custom_call.1
= control target key start
LH: loop header
LB: loop body
LE: loop exit
PB: predicated region body
PF: predicated region fallthrough
CT: control target
= control target key end

     0   :  { %12 = vsyncpa [#allocation3], 0  ;;  %s1295_s0 = inlined_call_operand.vmem [shape: f32[48,8], index: 0, kind: input, shape index: {}]   ;;  %s1296_s1 = inlined_call_operand.vmem [shape: bf16[3,8,16], index: 1, kind: input, shape index: {}]   ;;  %s1297_s2 = inlined_call_operand.vmem [shape: f32[1,16], index: 2, kind: input, shape index: {}]   ;;  %s1298_s3 = inlined_call_operand.hbm [shape: bf16[10,16,32], index: 3, kind: input, shape index: {}]   ;;  %s1299_s4 = inlined_call_operand.vmem [shape: f32[1,32], index: 4, kind: input, shape index: {}]   ;;  %s1300_s5 = inlined_call_operand.hbm [shape: f32[4,32], index: 5, kind: output, shape index: {0}]   ;;  %s1301_s6 = inlined_call_operand.vmem [shape: f32[40,16], index: 6, kind: output, shape index: {1}]  }
   0x1   :  { %13 = vsyncpa [#allocation4], 0  ;;  %s1102_s21 = smov [#allocation2]   ;;  %s1054_s25 = scalar_lea.hbm %s1298_s3, 1280 }
   0x2   :  { %s25_s22 = sshll.u32 %s1102_s21, 4  ;;  %p1055_p0 = scmp.ne.s32.totalorder %s1298_s3, %s1054_s25  ;;  %s26_s22 = int_to_ptr.vmem [resolvable:$true] %s25_s22 }
   0x3   :  { %p1058_p1 = scmp.lt.u32.totalorder %s1054_s25, %s1298_s3 }
   0x5   :  { %p1060_p2 = pnand %p1058_p1, %p1055_p0 }
   0x7   :  { %1063 = shalt.err (!%p1060_p2)
}
   0x8   :  { %s1064_s30 = scalar_lea.vmem %s26_s22, 1280  ;;  %p1069_p4 = scmp.lt.s32.totalorder %s26_s22, %s26_s22 }
   0x9   :  { %p1065_p3 = scmp.ne.s32.totalorder %s26_s22, %s1064_s30  ;;  %p1070_p5 = scmp.lt.s32.totalorder %s1064_s30, %s1064_s30 }
   0xb   :  { %p1071_p6 = por %p1070_p5, %p1069_p4 }
   0xd   :  { %p1072_p7 = pnand %p1071_p6, %p1065_p3 }
   0xf   :  { %1075 = shalt.err (!%p1072_p7)
}
  0x10   :  { %s1103_s7 = smov 64   ;;  %s1104_s8 = smov 4  }
  0x11   :  { %31 = dma.hbm_to_vmem [thread:$0]  %s1298_s3, 1280, %s26_s22, [#allocation3], %s1103_s7, %s1103_s7, %s1104_s8  }
  0x12   :  { %1098 = dma.done.wait [#allocation3], 1280  }
  0x13   :  { %1099 = vsyncadd [#allocation3], 4294966016  ;;  %v1105_v0 = vmov 0.0   ;;  %vm1106_vm0 = vmmov 0   ;;  %vm69_vm1 = vcmask 1043456   ;;  %v38_v3 = vld [vmem:[%s1295_s0] sm:$0xff] }
  0x14   :  { %936 = vmatprep.subr.bf16.mxu0 %v1105_v0  ;;  %950 = vmatprep.subr.bf16.mxu1 %v1105_v0  ;;  %v871_v1 = vld [vmem:[%s1296_s1 + $0x4] sm:$0xf]  ;;  %v47_v2 = vld [vmem:[%s1296_s1] sm:$0xf]  ;;  %v39_v6 = vld [vmem:[%s1295_s0 + $0x8] sm:$0xff]  ;;  %vm59_vm2 = vcmask 64512  }
  0x15   :  { %938 = vmatprep.mubr.msk.bf16.mxu0 %vm1106_vm0, %v1105_v0  ;;  %952 = vmatprep.mubr.msk.bf16.mxu1 %vm1106_vm0, %v1105_v0  ;;  %v71_v4 = vsel %vm69_vm1, %v871_v1, 0  ;;  %v139_v5 = vsel %vm69_vm1, %v47_v2, 0  ;;  %v40_v7 = vld [vmem:[%s1295_s0 + $0x10] sm:$0xff]  ;;  %v41_v8 = vld [vmem:[%s1295_s0 + $0x18] sm:$0xff]  ;;  %v44_v9 = vpack.c.bf16 %v39_v6, %v38_v3  ;;  %v878_v11 = vld [vmem:[%s1296_s1 + $0x8] sm:$0xf] }
  0x16   :  { %937 = vmatpush3.bf16.msra.mxu0 %v71_v4  ;;  %951 = vmatpush3.bf16.msra.mxu1 %v139_v5  ;;  %v45_v10 = vpack.c.bf16 %v41_v8, %v40_v7  ;;  %v42_v12 = vld [vmem:[%s1295_s0 + $0x20] sm:$0xff]  ;;  %v43_v13 = vld [vmem:[%s1295_s0 + $0x28] sm:$0xff]  ;;  %vm53_vm3 = vcmask 1045504   ;;  %v215_v17 = vsel %vm69_vm1, %v878_v11, 0  ;;  %v1045_v27 = vld [vmem:[#allocation2 + $0x18] sm:$0xff]   ;;  %vm295_vm4 = vcmask 130048  }
  0x17   :  { %964 = vmatprep.subr.bf16.mxu0 %v1105_v0  ;;  %v46_v14 = vpack.c.bf16 %v43_v13, %v42_v12  ;;  %978 = vmatprep.subr.bf16.mxu1 %v1105_v0  ;;  %v54_v15 = vrot.slane %v44_v9, 2  ;;  %v200_v21 = vrot.slane %v44_v9, 4  ;;  %v1044_v26 = vld [vmem:[#allocation2 + $0x8] sm:$0xff]   ;;  %v882_v58 = vld [vmem:[%s1297_s2] ss:$0 sm:$0xff]  ;;  %s1107_s13 = smov [#allocation5]  }
  0x18   :  { %v55_v16 = vrot.slane %v45_v10, 2  ;;  %v201_v22 = vrot.slane %v45_v10, 4  ;;  %v1047_v11 = vld [vmem:[#allocation2 + $0x28] sm:$0xff]   ;;  %s858_s14 = sshll.u32 %s1107_s13, 4  ;;  %vm850_vm5 = vcmask 257024   ;;  %s859_s14 = int_to_ptr.vmem [resolvable:$true] %s858_s14 }
  0x19   :  { %953 = vmatmul.mubr.msk.bf16.vlgmr.msra.gmra.mrb[0].mxu1 %vm59_vm2, %v44_v9  ;;  %v57_v18 = vrot.slane %v46_v14, 2  ;;  %v203_v24 = vrot.slane %v46_v14, 4  ;;  %s1076_s15 = scalar_lea.vmem %s859_s14, 64  ;;  %p1081_p9 = scmp.lt.s32.totalorder %s859_s14, %s859_s14 }
  0x1a   :  { %v56_v19 = vsel %vm53_vm3, %v54_v15, %v55_v16  ;;  %956 = vmatprep.mubr.msk.bf16.mxu1 %vm1106_vm0, %v1105_v0  ;;  %v202_v23 = vsel %vm69_vm1, %v200_v21, %v201_v22  ;;  %979 = vmatpush3.bf16.msra.mxu1 %v1044_v26  ;;  %p1077_p8 = scmp.ne.s32.totalorder %s859_s14, %s1076_s15  ;;  %p1082_p10 = scmp.lt.s32.totalorder %s1076_s15, %s1076_s15 }
  0x1b   :  { %939 = vmatmul.mubr.msk.bf16.vlgmr.msra.gmra.mrb[0].mxu0 %vm59_vm2, %v56_v19  ;;  %v58_v20 = vsel %vm53_vm3, %v55_v16, %v57_v18  ;;  %v204_v25 = vsel %vm69_vm1, %v201_v22, %v203_v24  ;;  %984 = vmatprep.subr.bf16.mxu1 %v1105_v0 }
  0x1c   :  { %965 = vmatpush3.bf16.msra.mxu0 %v215_v17  ;;  %942 = vmatprep.mubr.msk.bf16.mxu0 %vm1106_vm0, %v1105_v0  ;;  %p1083_p11 = por %p1082_p10, %p1081_p9 }
  0x1d   :  { %996 = vmatprep.subr.bf16.mxu0 %v1105_v0 }
  0x1e   :  { %p1084_p12 = pnand %p1083_p11, %p1077_p8 }
  0x21   :  { %957 = vmatmul.mubr.msk.bf16.gmra.mrb[4].mxu1 %vm59_vm2, %v45_v10  ;;  %v1046_v10 = vld [vmem:[#allocation2] sm:$0xff]  }
  0x22   :  { %960 = vmatprep.mubr.msk.bf16.mxu1 %vm1106_vm0, %v1105_v0 }
  0x23   :  { %943 = vmatmul.mubr.msk.bf16.gmra.mrb[4].mxu0 %vm59_vm2, %v58_v20 }
  0x24   :  { %946 = vmatprep.mubr.msk.bf16.mxu0 %vm1106_vm0, %v1105_v0 }
  0x29   :  { %961 = vmatmul.mubr.msk.bf16.gmra.mrb[8].mxu1 %vm59_vm2, %v46_v14 }
  0x2a   :  { %980 = vmatprep.mubr.msk.bf16.mxu1 %vm1106_vm0, %v1105_v0 }
  0x2b   :  { %947 = vmatmul.mubr.msk.bf16.gmra.mrb[8].mxu0 %vm59_vm2, %v57_v18 }
  0x2c   :  { %966 = vmatprep.mubr.msk.bf16.mxu0 %vm1106_vm0, %v1105_v0 }
  0x33   :  { %967 = vmatmul.mubr.msk.bf16.vlgmr.msra.gmra.mrb[12].mxu0 %vm59_vm2, %v202_v23 }
  0x34   :  { %970 = vmatprep.mubr.msk.bf16.mxu0 %vm1106_vm0, %v1105_v0  ;;  %997 = vmatpush3.bf16.msra.mxu0 %v1045_v27 }
  0x35   :  { %1008 = vmatprep.subr.bf16.mxu0 %v1105_v0 }
  0x3b   :  { %971 = vmatmul.mubr.msk.bf16.gmra.mrb[16].mxu0 %vm59_vm2, %v204_v25  ;;  %v1049_v25 = vld [vmem:[#allocation2 + $0x38] sm:$0xff]  }
  0x3c   :  { %974 = vmatprep.mubr.msk.bf16.mxu0 %vm1106_vm0, %v1105_v0 }
  0x43   :  { %975 = vmatmul.mubr.msk.bf16.gmra.mrb[20].mxu0 %vm59_vm2, %v203_v24  ;;  %v1048_v24 = vld [vmem:[#allocation2 + $0x10] sm:$0xff]  }
  0x44   :  { %998 = vmatprep.mubr.msk.bf16.mxu0 %vm1106_vm0, %v1105_v0 }
  0xec   :  { %v175_v28 = vpop.f32.mrb[0].mxu1 }
  0xed   :  { %v954_v29 = vpop.f32.mrb[1].mxu1 }
  0xee   :  { %v107_v30 = vpop.f32.mrb[0].mxu0  ;;  %v178_v31 = vpop.f32.mrb[2].mxu1 }
  0xef   :  { %v176_v32 = vadd.f32 %v175_v28, %v107_v30  ;;  %v940_v33 = vpop.f32.mrb[1].mxu0  ;;  %v955_v34 = vpop.f32.mrb[3].mxu1 }
  0xf0   :  { %v110_v35 = vpop.f32.mrb[2].mxu0 }
  0xf1   :  { %v179_v36 = vadd.f32 %v178_v31, %v110_v35  ;;  %v941_v37 = vpop.f32.mrb[3].mxu0  ;;  %v1050_v31 = vld [vmem:[#allocation2 + $0x20] sm:$0xff]  }
  0xf4   :  { %v183_v38 = vpop.f32.mrb[4].mxu1 }
  0xf5   :  { %v958_v39 = vpop.f32.mrb[5].mxu1 }
  0xf6   :  { %v115_v40 = vpop.f32.mrb[4].mxu0  ;;  %v186_v41 = vpop.f32.mrb[6].mxu1 }
  0xf7   :  { %v184_v42 = vadd.f32 %v183_v38, %v115_v40  ;;  %v944_v43 = vpop.f32.mrb[5].mxu0  ;;  %v959_v44 = vpop.f32.mrb[7].mxu1  ;;  %v1053_v38 = vld [vmem:[#allocation2 + $0x40] sm:$0xff]  }
  0xf8   :  { %v118_v45 = vpop.f32.mrb[6].mxu0 }
  0xf9   :  { %v187_v46 = vadd.f32 %v186_v41, %v118_v45  ;;  %v945_v47 = vpop.f32.mrb[7].mxu0 }
  0xfc   :  { %v191_v48 = vpop.f32.mrb[8].mxu1 }
  0xfd   :  { %v962_v49 = vpop.f32.mrb[9].mxu1 }
  0xfe   :  { %v123_v50 = vpop.f32.mrb[8].mxu0  ;;  %v194_v51 = vpop.f32.mrb[10].mxu1 }
  0xff   :  { %v192_v52 = vadd.f32 %v191_v48, %v123_v50  ;;  %v948_v53 = vpop.f32.mrb[9].mxu0  ;;  %v963_v54 = vpop.f32.mrb[11].mxu1 }
 0x100   :  { %v126_v55 = vpop.f32.mrb[10].mxu0 }
 0x101   :  { %v949_v56 = vpop.f32.mrb[11].mxu0 }
 0x106   :  { %v251_v57 = vpop.f32.mrb[12].mxu0 }
 0x107   :  { %v273_v59 = vadd.f32 %v251_v57, %v176_v32  ;;  %v968_v60 = vpop.f32.mrb[13].mxu0  ;;  %v1051_v32 = vld [vmem:[#allocation2 + $0x48] sm:$0xff]  }
 0x108   :  { %v254_v61 = vpop.f32.mrb[14].mxu0 }
 0x109   :  { %v285_v62 = vadd.f32 %v882_v58, %v273_v59  ;;  %v274_v63 = vadd.f32 %v254_v61, %v179_v36  ;;  %v969_v1 = vpop.f32.mrb[15].mxu0  ;;  %v1052_v36 = vld [vmem:[#allocation2 + $0x30] sm:$0xff]  }
 0x10b   :  { %v290_v2 = vmax.f32 %v285_v62, 0.0  ;;  %v286_v3 = vadd.f32 %v882_v58, %v274_v63 }
 0x10d   :  { %296 = vst.msk [vmem:[%s1301_s6] sm:$0xff] %vm295_vm4, %v290_v2  ;;  %v291_v4 = vmax.f32 %v286_v3, 0.0 }
 0x10e   :  { %v259_v5 = vpop.f32.mrb[16].mxu0 }
 0x10f   :  { %297 = vst.msk [vmem:[%s1301_s6 + $0x8] sm:$0xff] %vm295_vm4, %v291_v4  ;;  %v301_v6 = vpack.c.bf16 %v291_v4, %v290_v2  ;;  %v275_v7 = vadd.f32 %v259_v5, %v184_v42  ;;  %v972_v8 = vpop.f32.mrb[17].mxu0 }
 0x110   :  { %v262_v9 = vpop.f32.mrb[18].mxu0 }
 0x111   :  { %v310_v12 = vrot.slane %v301_v6, 2  ;;  %v466_v13 = vrot.slane %v301_v6, 6  ;;  %v287_v14 = vadd.f32 %v882_v58, %v275_v7  ;;  %v276_v15 = vadd.f32 %v262_v9, %v187_v46  ;;  %v973_v16 = vpop.f32.mrb[19].mxu0 }
 0x112   :  { %v412_v33 = vrot.slane %v301_v6, 4 }
 0x113   :  { %v292_v17 = vmax.f32 %v287_v14, 0.0  ;;  %v288_v18 = vadd.f32 %v882_v58, %v276_v15  ;;  %981 = vmatmul.mubr.msk.bf16.vlgmr.msra.gmra.mrb[12].mxu1 %vm295_vm4, %v310_v12  ;;  %999 = vmatmul.mubr.msk.bf16.vlgmr.msra.gmra.mrb[24].mxu0 %vm295_vm4, %v466_v13 }
 0x114   :  { %985 = vmatpush3.bf16.msra.mxu1 %v1046_v10  ;;  %1009 = vmatpush3.bf16.msra.mxu0 %v1047_v11 }
 0x115   :  { %298 = vst.msk [vmem:[%s1301_s6 + $0x10] sm:$0xff] %vm295_vm4, %v292_v17  ;;  %v293_v19 = vmax.f32 %v288_v18, 0.0  ;;  %986 = vmatprep.mubr.msk.bf16.mxu1 %vm1106_vm0, %v1105_v0  ;;  %990 = vmatprep.subr.bf16.mxu1 %v1105_v0 }
 0x116   :  { %v267_v20 = vpop.f32.mrb[20].mxu0  ;;  %1010 = vmatprep.mubr.msk.bf16.mxu0 %vm1106_vm0, %v1105_v0  ;;  %1020 = vmatprep.subr.bf16.mxu0 %v1105_v0 }
 0x117   :  { %299 = vst.msk [vmem:[%s1301_s6 + $0x18] sm:$0xff] %vm295_vm4, %v293_v19  ;;  %v302_v21 = vpack.c.bf16 %v293_v19, %v292_v17  ;;  %v277_v22 = vadd.f32 %v267_v20, %v192_v52  ;;  %v976_v23 = vpop.f32.mrb[21].mxu0 }
 0x118   :  { %v270_v26 = vpop.f32.mrb[22].mxu0 }
 0x119   :  { %v289_v27 = vadd.f32 %v882_v58, %v277_v22  ;;  %v574_v28 = vrot.slane %v302_v21, 2  ;;  %v977_v29 = vpop.f32.mrb[23].mxu0  ;;  %v682_v34 = vrot.slane %v302_v21, 6  ;;  %v628_v39 = vrot.slane %v302_v21, 4  ;;  %v903_v22 = vld [vmem:[%s1299_s4] ss:$0 sm:$0xff] }
 0x11b   :  { %v294_v30 = vmax.f32 %v289_v27, 0.0  ;;  %987 = vmatmul.mubr.msk.bf16.vlgmr.msra.gmra.mrb[16].mxu1 %vm295_vm4, %v301_v6  ;;  %1011 = vmatmul.mubr.msk.bf16.vlgmr.msra.gmra.mrb[28].mxu0 %vm295_vm4, %v574_v28 }
 0x11c   :  { %991 = vmatpush3.bf16.msra.mxu1 %v1048_v24  ;;  %1021 = vmatpush3.bf16.msra.mxu0 %v1049_v25 }
 0x11d   :  { %300 = vst.msk [vmem:[%s1301_s6 + $0x20] sm:$0xff] %vm295_vm4, %v294_v30  ;;  %992 = vmatprep.mubr.msk.bf16.mxu1 %vm1106_vm0, %v1105_v0  ;;  %1002 = vmatprep.subr.bf16.mxu1 %v1105_v0  ;;  %v303_v35 = vpack.c.bf16 %v294_v30, %v294_v30 }
 0x11e   :  { %1022 = vmatprep.mubr.msk.bf16.mxu0 %vm1106_vm0, %v1105_v0  ;;  %1032 = vmatprep.subr.bf16.mxu0 %v1105_v0 }
 0x11f   :  { %v790_v37 = vrot.slane %v303_v35, 2 }
 0x123   :  { %993 = vmatmul.mubr.msk.bf16.vlgmr.msra.gmra.mrb[20].mxu1 %vm295_vm4, %v412_v33  ;;  %1023 = vmatmul.mubr.msk.bf16.vlgmr.msra.gmra.mrb[32].mxu0 %vm295_vm4, %v682_v34 }
 0x124   :  { %1003 = vmatpush3.bf16.msra.mxu1 %v1050_v31  ;;  %1033 = vmatpush3.bf16.msra.mxu0 %v1051_v32 }
 0x125   :  { %1004 = vmatprep.mubr.msk.bf16.mxu1 %vm1106_vm0, %v1105_v0  ;;  %1014 = vmatprep.subr.bf16.mxu1 %v1105_v0 }
 0x126   :  { %1034 = vmatprep.mubr.msk.bf16.mxu0 %vm1106_vm0, %v1105_v0 }
 0x12b   :  { %1005 = vmatmul.mubr.msk.bf16.vlgmr.msra.gmra.mrb[24].mxu1 %vm295_vm4, %v302_v21  ;;  %1035 = vmatmul.mubr.msk.bf16.vlgmr.msra.gmra.mrb[36].mxu0 %vm295_vm4, %v790_v37 }
 0x12c   :  { %1015 = vmatpush3.bf16.msra.mxu1 %v1052_v36  ;;  %1016 = vmatprep.mubr.msk.bf16.mxu1 %vm1106_vm0, %v1105_v0 }
 0x12d   :  { %1026 = vmatprep.subr.bf16.mxu1 %v1105_v0 }
 0x133   :  { %1017 = vmatmul.mubr.msk.bf16.vlgmr.msra.gmra.mrb[28].mxu1 %vm295_vm4, %v628_v39 }
 0x134   :  { %1027 = vmatpush3.bf16.msra.mxu1 %v1053_v38  ;;  %1028 = vmatprep.mubr.msk.bf16.mxu1 %vm1106_vm0, %v1105_v0 }
 0x13b   :  { %1029 = vmatmul.mubr.msk.bf16.vlgmr.msra.gmra.mrb[32].mxu1 %vm295_vm4, %v303_v35 }
 0x1e6   :  { %v354_v40 = vpop.f32.mrb[12].mxu1  ;;  %v510_v41 = vpop.f32.mrb[24].mxu0 }
 0x1e7   :  { %v982_v42 = vpop.f32.mrb[13].mxu1  ;;  %v1000_v43 = vpop.f32.mrb[25].mxu0 }
 0x1e8   :  { %v357_v44 = vpop.f32.mrb[14].mxu1  ;;  %v513_v45 = vpop.f32.mrb[26].mxu0 }
 0x1e9   :  { %v983_v46 = vpop.f32.mrb[15].mxu1  ;;  %v1001_v47 = vpop.f32.mrb[27].mxu0 }
 0x1ee   :  { %v403_v48 = vpop.f32.mrb[16].mxu1  ;;  %v618_v49 = vpop.f32.mrb[28].mxu0 }
 0x1ef   :  { %v404_v50 = vadd.f32 %v403_v48, %v354_v40  ;;  %v988_v51 = vpop.f32.mrb[17].mxu1  ;;  %v1012_v52 = vpop.f32.mrb[29].mxu0 }
 0x1f0   :  { %v406_v53 = vpop.f32.mrb[18].mxu1  ;;  %v621_v54 = vpop.f32.mrb[30].mxu0 }
 0x1f1   :  { %v989_v55 = vpop.f32.mrb[19].mxu1  ;;  %v1013_v56 = vpop.f32.mrb[31].mxu0 }
 0x1f6   :  { %v456_v0 = vpop.f32.mrb[20].mxu1  ;;  %v726_v57 = vpop.f32.mrb[32].mxu0 }
 0x1f7   :  { %v462_v58 = vadd.f32 %v456_v0, %v404_v50  ;;  %v994_v59 = vpop.f32.mrb[21].mxu1  ;;  %v1024_v60 = vpop.f32.mrb[33].mxu0 }
 0x1f8   :  { %v459_v61 = vpop.f32.mrb[22].mxu1  ;;  %v729_v62 = vpop.f32.mrb[34].mxu0 }
 0x1f9   :  { %v995_v63 = vpop.f32.mrb[23].mxu1  ;;  %v1025_v1 = vpop.f32.mrb[35].mxu0  ;;  %v516_v2 = vadd.f32 %v510_v41, %v462_v58 }
 0x1fe   :  { %v563_v3 = vpop.f32.mrb[24].mxu1  ;;  %v834_v4 = vpop.f32.mrb[36].mxu0 }
 0x1ff   :  { %v569_v5 = vadd.f32 %v563_v3, %v516_v2  ;;  %v1006_v6 = vpop.f32.mrb[25].mxu1  ;;  %v1036_v7 = vpop.f32.mrb[37].mxu0 }
 0x200   :  { %v566_v8 = vpop.f32.mrb[26].mxu1  ;;  %v837_v9 = vpop.f32.mrb[38].mxu0 }
 0x201   :  { %v1007_v10 = vpop.f32.mrb[27].mxu1  ;;  %v1037_v11 = vpop.f32.mrb[39].mxu0  ;;  %v624_v12 = vadd.f32 %v618_v49, %v569_v5 }
 0x206   :  { %v672_v13 = vpop.f32.mrb[28].mxu1 }
 0x207   :  { %v678_v14 = vadd.f32 %v672_v13, %v624_v12  ;;  %v1018_v15 = vpop.f32.mrb[29].mxu1 }
 0x208   :  { %v675_v16 = vpop.f32.mrb[30].mxu1 }
 0x209   :  { %v1019_v17 = vpop.f32.mrb[31].mxu1  ;;  %v732_v18 = vadd.f32 %v726_v57, %v678_v14 }
 0x20e   :  { %v779_v19 = vpop.f32.mrb[32].mxu1 }
 0x20f   :  { %v785_v20 = vadd.f32 %v779_v19, %v732_v18  ;;  %v1030_v21 = vpop.f32.mrb[33].mxu1 }
 0x210   :  { %v782_v23 = vpop.f32.mrb[34].mxu1 }
 0x211   :  { %v840_v24 = vadd.f32 %v834_v4, %v785_v20  ;;  %v1031_v25 = vpop.f32.mrb[35].mxu1 }
 0x213   :  { %v848_v26 = vadd.f32 %v903_v22, %v840_v24 }
 0x215   :  { %v849_v27 = vmax.f32 %v848_v26, 0.0 }
 0x217   :  { %851 = vst.msk [vmem:[#allocation5] sm:$0xf] %vm850_vm5, %v849_v27 }
 0x218   :  { %1087 = shalt.err (!%p1084_p12)
}
 0x219   :  { %s1088_s4 = scalar_lea.hbm %s1300_s5, 64 }
 0x21a   :  { %p1089_p13 = scmp.ne.s32.totalorder %s1300_s5, %s1088_s4  ;;  %p1092_p0 = scmp.lt.u32.totalorder %s1088_s4, %s1300_s5 }
 0x21c   :  { %p1094_p1 = pnand %p1092_p0, %p1089_p13 }
 0x21e   :  { %1097 = shalt.err (!%p1094_p1)
}
 0x21f   :  { %861 = dma.vmem_to_hbm [thread:$0]  %s859_s14, 64, %s1300_s5, [#allocation4]  }
 0x220   :  { %1100 = dma.done.wait [#allocation4], 64  }
 0x221   :  { %1101 = vsyncadd [#allocation4], 4294967232 }
 0x222   :  { %869 = vsyncpa [#allocation3], 1 }
 0x223   :  { %870 = vsyncpa [#allocation4], 1 }

</bundles_post_ra>
